<compile_context>
chip_gen: v7x
topology: tpu7x:2x2x1
jax: 0.10.0
libtpu: 0.0.40
codegen_flags: <defaults>
</compile_context>

<pallas_src>
import functools

import jax
import jax.numpy as jnp
from jax.experimental import pallas as pl
from jax.experimental.pallas import tpu as pltpu


def _round_up(x, m):
    return ((x + m - 1) // m) * m


def _dice_sums_kernel(pred_ref, true_ref, out_ref, acc_ref):
    # pred_ref: (1, C, TR, 128) logits (input dtype), one L-tile of one batch elem
    # true_ref: (1, TR, 128) int32 labels, -1 marks padded pixels
    # out_ref : (1, 3, C, 128) f32 per-batch lane partials
    #           row 0 = intersect, row 1 = y_sum, row 2 = z_sum
    # acc_ref : (3, C, TR, 128) f32 scratch accumulator (resident across L-tiles)
    t = pl.program_id(1)

    @pl.when(t == 0)
    def _():
        acc_ref[...] = jnp.zeros_like(acc_ref)

    x = pred_ref[0].astype(jnp.float32)               # (C, TR, 128)
    y = true_ref[0]                                   # (TR, 128) int32

    # Softmax over the class axis: C is the leading (non-tiled) axis, so the
    # max / sum over axis 0 are elementwise ops across C fully packed vregs
    # (VPU) and exp / reciprocal go to the EUP -- no XLU work per tile.
    m = jnp.max(x, axis=0, keepdims=True)             # (1, TR, 128)
    e = jnp.exp(x - m)
    denom = jnp.sum(e, axis=0, keepdims=True)
    inv = pl.reciprocal(denom, approx=True)
    inv = inv * (2.0 - denom * inv)                   # one Newton step -> ~f32 exact
    p = e * inv                                       # (C, TR, 128)

    # One-hot target + validity mask (padded pixels have label -1).
    cls = jax.lax.broadcasted_iota(jnp.int32, x.shape, 0)       # (C, TR, 128)
    t_onehot = (y[None, :, :] == cls).astype(jnp.float32)       # zero on padding
    mask = (y >= 0).astype(jnp.float32)[None, :, :]             # (1, TR, 128)
    p_m = p * mask                                              # masked probs

    # Elementwise accumulation only; all cross-lane/sublane reductions are
    # deferred to the last tile.
    acc_ref[0] += p_m * t_onehot          # intersect
    acc_ref[1] += t_onehot                # y_sum   (t is one-hot, so t*t == t)
    acc_ref[2] += p_m * p_m               # z_sum

    @pl.when(t == pl.num_programs(1) - 1)
    def _():
        out_ref[0, 0] = jnp.sum(acc_ref[0], axis=1)   # (C, 128) lane partials
        out_ref[0, 1] = jnp.sum(acc_ref[1], axis=1)
        out_ref[0, 2] = jnp.sum(acc_ref[2], axis=1)


@functools.partial(jax.jit, static_argnames=("num_classes",))
def dice_loss(y_pred, y_true, weight=None, num_classes=3):
    """Pallas implementation of DiceLoss.forward (crossentropy=False, penalty=False).

    y_pred: (N, C, H, W) float logits (f32 or bf16; kept in input dtype for HBM)
    y_true: (N, H, W)    int labels in [0, num_classes)
    """
    N, C, H, W = y_pred.shape
    assert C == num_classes
    L = H * W

    rows = -(-L // 128)                   # 128-lane rows per image
    TR = min(512, _round_up(rows, 8))     # L-tile height (sublanes)
    ROWS = _round_up(rows, TR)
    L_pad = ROWS * 128

    # Keep logits in their input dtype (bf16 stays bf16 -> half the dominant
    # HBM read stream); cast to f32 inside the kernel after the load.
    pred = y_pred.reshape(N, C, L)
    if L_pad != L:
        pred = jnp.pad(pred, ((0, 0), (0, 0), (0, L_pad - L)))
    pred = pred.reshape(N, C, ROWS, 128)

    # Labels as int32 with -1 padding.  (int8 would cut this stream 4x more
    # but needs 32-row tile alignment; left as a follow-up.)
    true = y_true.reshape(N, L).astype(jnp.int32)
    if L_pad != L:
        true = jnp.pad(true, ((0, 0), (0, L_pad - L)), constant_values=-1)
    true = true.reshape(N, ROWS, 128)

    num_tiles = ROWS // TR

    partials = pl.pallas_call(
        _dice_sums_kernel,
        out_shape=jax.ShapeDtypeStruct((N, 3, C, 128), jnp.float32),
        grid_spec=pltpu.PrefetchScalarGridSpec(
            num_scalar_prefetch=0,
            grid=(N, num_tiles),
            in_specs=[
                pl.BlockSpec((1, C, TR, 128), lambda b, t: (b, 0, t, 0)),
                pl.BlockSpec((1, TR, 128), lambda b, t: (b, t, 0)),
            ],
            out_specs=pl.BlockSpec((1, 3, C, 128), lambda b, t: (b, 0, 0, 0)),
            scratch_shapes=[pltpu.VMEM((3, C, TR, 128), jnp.float32)],
        ),
        compiler_params=pltpu.CompilerParams(
            # Batch axis parallel -> megacore sharding on v7x (per-batch
            # partial sums are summed in the glue); L-tile axis is the
            # sequential reduction axis.
            dimension_semantics=("parallel", "arbitrary")),
    )(pred, true)

    sums = jnp.sum(partials, axis=(0, 3))          # (3, C)
    intersect, y_sum, z_sum = sums[0], sums[1], sums[2]

    smooth = 1e-05
    per_class_dice = 1.0 - (2.0 * intersect + smooth) / (z_sum + y_sum + smooth)

    if weight is None:
        weight = jnp.ones((num_classes,), dtype=jnp.float32)
    else:
        weight = jnp.asarray(weight, dtype=jnp.float32)

    return jnp.sum(per_class_dice * weight) / num_classes


def _reference(y_pred, y_true, num_classes=3):
    # pure-JAX reference for sanity checking
    p = jax.nn.softmax(y_pred, axis=1)
    smooth = 1e-05
    loss = 0.0
    for i in range(num_classes):
        t = (y_true == i).astype(jnp.float32)
        s = p[:, i, :, :]
        intersect = jnp.sum(s * t)
        y_sum = jnp.sum(t * t)
        z_sum = jnp.sum(s * s)
        loss += 1.0 - (2 * intersect + smooth) / (z_sum + y_sum + smooth)
    return loss / num_classes


if __name__ == "__main__":
    key = jax.random.PRNGKey(0)
    k1, k2 = jax.random.split(key)

    N, C, H, W = 2, 3, 16, 16  # num_classes = 3 (module default)
    y_pred = jax.random.normal(k1, (N, C, H, W), dtype=jnp.float32)
    y_true = jax.random.randint(k2, (N, H, W), 0, C, dtype=jnp.int32)

    out = dice_loss(y_pred, y_true, num_classes=C)
    out = jax.block_until_ready(out)

    ref = _reference(y_pred, y_true, num_classes=C)
    assert jnp.allclose(out, ref, atol=1e-4, rtol=1e-4), (out, ref)

    # TODO(synk): crossentropy / give_penalty branches are off by default
    # (crossentropy=False, give_penalty=False) and are not implemented here.
    print("KERNEL_OK")
</pallas_src>

<mosaic_0001>
module attributes {stable_mosaic.version = 11 : i64} {
  func.func @_dice_sums_kernel(%arg0: i32, %arg1: i32, %arg2: memref<1x3x8x128xf32, #tpu.memory_space<vmem>>, %arg3: memref<1x8x128xi32, #tpu.memory_space<vmem>>, %arg4: memref<1x3x3x128xf32, #tpu.memory_space<vmem>>, %arg5: memref<3x3x8x128xf32, #tpu.memory_space<vmem>>) attributes {dimension_semantics = [#tpu.dimension_semantics<parallel>, #tpu.dimension_semantics<arbitrary>], iteration_bounds = array<i64: 2, 1>, scalar_prefetch = 0 : i64, scratch_operands = 1 : i64, tpu.core_type = #tpu.core_type<tc>, window_params = [{transform_indices = @transform_0, window_bounds = array<i64: 1, 3, 8, 128>}, {transform_indices = @transform_1, window_bounds = array<i64: 1, 8, 128>}, {transform_indices = @transform_2, window_bounds = array<i64: 1, 3, 3, 128>}]} {
    %c0_i32 = arith.constant 0 : i32
    %0 = arith.cmpi eq, %arg1, %c0_i32 : i32
    %1 = arith.extui %0 : i1 to i32
    %c0_i32_0 = arith.constant 0 : i32
    %2 = arith.cmpi ne, %1, %c0_i32_0 : i32
    scf.if %2 {
      %cst_34 = arith.constant 0.000000e+00 : f32
      %57 = vector.broadcast %cst_34 : f32 to vector<3x3x8x128xf32>
      %c0_35 = arith.constant 0 : index
      %c0_36 = arith.constant 0 : index
      %c0_37 = arith.constant 0 : index
      %c0_38 = arith.constant 0 : index
      %58 = vector.load %arg5[%c0_35, %c0_36, %c0_37, %c0_38] : memref<3x3x8x128xf32, #tpu.memory_space<vmem>>, vector<3x3x8x128xf32>
      tpu.vector_store %arg5[%c0_35, %c0_36, %c0_37, %c0_38], %57 {strides = array<i32>} : memref<3x3x8x128xf32, #tpu.memory_space<vmem>>, vector<3x3x8x128xf32>,
    } else {
    }
    %c0 = arith.constant 0 : index
    %c0_1 = arith.constant 0 : index
    %c0_2 = arith.constant 0 : index
    %c0_3 = arith.constant 0 : index
    %3 = vector.load %arg2[%c0, %c0_1, %c0_2, %c0_3] : memref<1x3x8x128xf32, #tpu.memory_space<vmem>>, vector<1x3x8x128xf32>
    %4 = vector.shape_cast %3 : vector<1x3x8x128xf32> to vector<3x8x128xf32>
    %c0_4 = arith.constant 0 : index
    %c0_5 = arith.constant 0 : index
    %c0_6 = arith.constant 0 : index
    %5 = vector.load %arg3[%c0_4, %c0_5, %c0_6] : memref<1x8x128xi32, #tpu.memory_space<vmem>>, vector<1x8x128xi32>
    %6 = vector.shape_cast %5 : vector<1x8x128xi32> to vector<8x128xi32>
    %cst = arith.constant dense<0xFF800000> : vector<8x128xf32>
    %7 = vector.multi_reduction <maximumf>, %4, %cst [0] : vector<3x8x128xf32> to vector<8x128xf32>
    %8 = vector.shape_cast %7 : vector<8x128xf32> to vector<1x8x128xf32>
    %9 = vector.broadcast %8 : vector<1x8x128xf32> to vector<3x8x128xf32>
    %10 = arith.subf %4, %9 : vector<3x8x128xf32>
    %11 = math.exp %10 : vector<3x8x128xf32>
    %cst_7 = arith.constant dense<0.000000e+00> : vector<8x128xf32>
    %12 = vector.multi_reduction <add>, %11, %cst_7 [0] : vector<3x8x128xf32> to vector<8x128xf32>
    %13 = vector.shape_cast %12 : vector<8x128xf32> to vector<1x8x128xf32>
    %14 = tpu.reciprocal %13 {approx = true} : vector<1x8x128xf32> -> vector<1x8x128xf32>
    %15 = arith.mulf %13, %14 : vector<1x8x128xf32>
    %cst_8 = arith.constant 2.000000e+00 : f32
    %16 = vector.broadcast %cst_8 : f32 to vector<1x8x128xf32>
    %17 = arith.subf %16, %15 : vector<1x8x128xf32>
    %18 = arith.mulf %14, %17 : vector<1x8x128xf32>
    %19 = vector.broadcast %18 : vector<1x8x128xf32> to vector<3x8x128xf32>
    %20 = arith.mulf %11, %19 : vector<3x8x128xf32>
    %21 = tpu.iota {dimensions = array<i32: 0>} : vector<3x8x128xi32>
    %22 = vector.shape_cast %6 : vector<8x128xi32> to vector<1x8x128xi32>
    %23 = vector.broadcast %22 : vector<1x8x128xi32> to vector<3x8x128xi32>
    %24 = arith.cmpi eq, %23, %21 : vector<3x8x128xi32>
    %25 = arith.extui %24 : vector<3x8x128xi1> to vector<3x8x128xi32>
    %26 = arith.sitofp %25 : vector<3x8x128xi32> to vector<3x8x128xf32>
    %c0_i32_9 = arith.constant 0 : i32
    %27 = vector.broadcast %c0_i32_9 : i32 to vector<8x128xi32>
    %28 = arith.cmpi sge, %6, %27 : vector<8x128xi32>
    %29 = arith.extui %28 : vector<8x128xi1> to vector<8x128xi32>
    %30 = arith.sitofp %29 : vector<8x128xi32> to vector<8x128xf32>
    %31 = vector.shape_cast %30 : vector<8x128xf32> to vector<1x8x128xf32>
    %32 = vector.broadcast %31 : vector<1x8x128xf32> to vector<3x8x128xf32>
    %33 = arith.mulf %20, %32 : vector<3x8x128xf32>
    %c0_10 = arith.constant 0 : index
    %c0_11 = arith.constant 0 : index
    %c0_12 = arith.constant 0 : index
    %c0_13 = arith.constant 0 : index
    %34 = vector.load %arg5[%c0_10, %c0_11, %c0_12, %c0_13] : memref<3x3x8x128xf32, #tpu.memory_space<vmem>>, vector<1x3x8x128xf32>
    %35 = vector.shape_cast %34 : vector<1x3x8x128xf32> to vector<3x8x128xf32>
    %36 = arith.mulf %33, %26 : vector<3x8x128xf32>
    %37 = arith.addf %35, %36 : vector<3x8x128xf32>
    %c0_14 = arith.constant 0 : index
    %c0_15 = arith.constant 0 : index
    %c0_16 = arith.constant 0 : index
    %c0_17 = arith.constant 0 : index
    %38 = vector.load %arg5[%c0_14, %c0_15, %c0_16, %c0_17] : memref<3x3x8x128xf32, #tpu.memory_space<vmem>>, vector<1x3x8x128xf32>
    %39 = vector.shape_cast %38 : vector<1x3x8x128xf32> to vector<3x8x128xf32>
    %40 = vector.shape_cast %37 : vector<3x8x128xf32> to vector<1x3x8x128xf32>
    tpu.vector_store %arg5[%c0_14, %c0_15, %c0_16, %c0_17], %40 {strides = array<i32>} : memref<3x3x8x128xf32, #tpu.memory_space<vmem>>, vector<1x3x8x128xf32>,
    %c1 = arith.constant 1 : index
    %c0_18 = arith.constant 0 : index
    %c0_19 = arith.constant 0 : index
    %c0_20 = arith.constant 0 : index
    %41 = vector.load %arg5[%c1, %c0_18, %c0_19, %c0_20] : memref<3x3x8x128xf32, #tpu.memory_space<vmem>>, vector<1x3x8x128xf32>
    %42 = vector.shape_cast %41 : vector<1x3x8x128xf32> to vector<3x8x128xf32>
    %43 = arith.addf %42, %26 : vector<3x8x128xf32>
    %c1_21 = arith.constant 1 : index
    %c0_22 = arith.constant 0 : index
    %c0_23 = arith.constant 0 : index
    %c0_24 = arith.constant 0 : index
    %44 = vector.load %arg5[%c1_21, %c0_22, %c0_23, %c0_24] : memref<3x3x8x128xf32, #tpu.memory_space<vmem>>, vector<1x3x8x128xf32>
    %45 = vector.shape_cast %44 : vector<1x3x8x128xf32> to vector<3x8x128xf32>
    %46 = vector.shape_cast %43 : vector<3x8x128xf32> to vector<1x3x8x128xf32>
    tpu.vector_store %arg5[%c1_21, %c0_22, %c0_23, %c0_24], %46 {strides = array<i32>} : memref<3x3x8x128xf32, #tpu.memory_space<vmem>>, vector<1x3x8x128xf32>,
    %c2 = arith.constant 2 : index
    %c0_25 = arith.constant 0 : index
    %c0_26 = arith.constant 0 : index
    %c0_27 = arith.constant 0 : index
    %47 = vector.load %arg5[%c2, %c0_25, %c0_26, %c0_27] : memref<3x3x8x128xf32, #tpu.memory_space<vmem>>, vector<1x3x8x128xf32>
    %48 = vector.shape_cast %47 : vector<1x3x8x128xf32> to vector<3x8x128xf32>
    %49 = arith.mulf %33, %33 : vector<3x8x128xf32>
    %50 = arith.addf %48, %49 : vector<3x8x128xf32>
    %c2_28 = arith.constant 2 : index
    %c0_29 = arith.constant 0 : index
    %c0_30 = arith.constant 0 : index
    %c0_31 = arith.constant 0 : index
    %51 = vector.load %arg5[%c2_28, %c0_29, %c0_30, %c0_31] : memref<3x3x8x128xf32, #tpu.memory_space<vmem>>, vector<1x3x8x128xf32>
    %52 = vector.shape_cast %51 : vector<1x3x8x128xf32> to vector<3x8x128xf32>
    %53 = vector.shape_cast %50 : vector<3x8x128xf32> to vector<1x3x8x128xf32>
    tpu.vector_store %arg5[%c2_28, %c0_29, %c0_30, %c0_31], %53 {strides = array<i32>} : memref<3x3x8x128xf32, #tpu.memory_space<vmem>>, vector<1x3x8x128xf32>,
    %c0_i32_32 = arith.constant 0 : i32
    %54 = arith.cmpi eq, %arg1, %c0_i32_32 : i32
    %55 = arith.extui %54 : i1 to i32
    %c0_i32_33 = arith.constant 0 : i32
    %56 = arith.cmpi ne, %55, %c0_i32_33 : i32
    scf.if %56 {
      %c0_34 = arith.constant 0 : index
      %c0_35 = arith.constant 0 : index
      %c0_36 = arith.constant 0 : index
      %c0_37 = arith.constant 0 : index
      %57 = vector.load %arg5[%c0_34, %c0_35, %c0_36, %c0_37] : memref<3x3x8x128xf32, #tpu.memory_space<vmem>>, vector<1x3x8x128xf32>
      %58 = vector.shape_cast %57 : vector<1x3x8x128xf32> to vector<3x8x128xf32>
      %cst_38 = arith.constant dense<0.000000e+00> : vector<3x128xf32>
      %59 = vector.multi_reduction <add>, %58, %cst_38 [1] : vector<3x8x128xf32> to vector<3x128xf32>
      %c0_39 = arith.constant 0 : index
      %c0_40 = arith.constant 0 : index
      %c0_41 = arith.constant 0 : index
      %c0_42 = arith.constant 0 : index
      %60 = vector.load %arg4[%c0_39, %c0_40, %c0_41, %c0_42] : memref<1x3x3x128xf32, #tpu.memory_space<vmem>>, vector<1x1x3x128xf32>
      %61 = vector.shape_cast %60 : vector<1x1x3x128xf32> to vector<3x128xf32>
      %62 = vector.shape_cast %59 : vector<3x128xf32> to vector<1x1x3x128xf32>
      tpu.vector_store %arg4[%c0_39, %c0_40, %c0_41, %c0_42], %62 {strides = array<i32>} : memref<1x3x3x128xf32, #tpu.memory_space<vmem>>, vector<1x1x3x128xf32>,
      %c1_43 = arith.constant 1 : index
      %c0_44 = arith.constant 0 : index
      %c0_45 = arith.constant 0 : index
      %c0_46 = arith.constant 0 : index
      %63 = vector.load %arg5[%c1_43, %c0_44, %c0_45, %c0_46] : memref<3x3x8x128xf32, #tpu.memory_space<vmem>>, vector<1x3x8x128xf32>
      %64 = vector.shape_cast %63 : vector<1x3x8x128xf32> to vector<3x8x128xf32>
      %cst_47 = arith.constant dense<0.000000e+00> : vector<3x128xf32>
      %65 = vector.multi_reduction <add>, %64, %cst_47 [1] : vector<3x8x128xf32> to vector<3x128xf32>
      %c0_48 = arith.constant 0 : index
      %c1_49 = arith.constant 1 : index
      %c0_50 = arith.constant 0 : index
      %c0_51 = arith.constant 0 : index
      %66 = vector.load %arg4[%c0_48, %c1_49, %c0_50, %c0_51] : memref<1x3x3x128xf32, #tpu.memory_space<vmem>>, vector<1x1x3x128xf32>
      %67 = vector.shape_cast %66 : vector<1x1x3x128xf32> to vector<3x128xf32>
      %68 = vector.shape_cast %65 : vector<3x128xf32> to vector<1x1x3x128xf32>
      tpu.vector_store %arg4[%c0_48, %c1_49, %c0_50, %c0_51], %68 {strides = array<i32>} : memref<1x3x3x128xf32, #tpu.memory_space<vmem>>, vector<1x1x3x128xf32>,
      %c2_52 = arith.constant 2 : index
      %c0_53 = arith.constant 0 : index
      %c0_54 = arith.constant 0 : index
      %c0_55 = arith.constant 0 : index
      %69 = vector.load %arg5[%c2_52, %c0_53, %c0_54, %c0_55] : memref<3x3x8x128xf32, #tpu.memory_space<vmem>>, vector<1x3x8x128xf32>
      %70 = vector.shape_cast %69 : vector<1x3x8x128xf32> to vector<3x8x128xf32>
      %cst_56 = arith.constant dense<0.000000e+00> : vector<3x128xf32>
      %71 = vector.multi_reduction <add>, %70, %cst_56 [1] : vector<3x8x128xf32> to vector<3x128xf32>
      %c0_57 = arith.constant 0 : index
      %c2_58 = arith.constant 2 : index
      %c0_59 = arith.constant 0 : index
      %c0_60 = arith.constant 0 : index
      %72 = vector.load %arg4[%c0_57, %c2_58, %c0_59, %c0_60] : memref<1x3x3x128xf32, #tpu.memory_space<vmem>>, vector<1x1x3x128xf32>
      %73 = vector.shape_cast %72 : vector<1x1x3x128xf32> to vector<3x128xf32>
      %74 = vector.shape_cast %71 : vector<3x128xf32> to vector<1x1x3x128xf32>
      tpu.vector_store %arg4[%c0_57, %c2_58, %c0_59, %c0_60], %74 {strides = array<i32>} : memref<1x3x3x128xf32, #tpu.memory_space<vmem>>, vector<1x1x3x128xf32>,
    } else {
    }
    return
  }
  func.func @transform_0(%arg0: i32, %arg1: i32) -> (i32, i32, i32, i32) {
    %c0_i32 = arith.constant 0 : i32
    %c0_i32_0 = arith.constant 0 : i32
    %c0_i32_1 = arith.constant 0 : i32
    return %arg0, %c0_i32, %arg1, %c0_i32_0 : i32, i32, i32, i32
  }
  func.func @transform_1(%arg0: i32, %arg1: i32) -> (i32, i32, i32) {
    %c0_i32 = arith.constant 0 : i32
    %c0_i32_0 = arith.constant 0 : i32
    return %arg0, %arg1, %c0_i32 : i32, i32, i32
  }
  func.func @transform_2(%arg0: i32, %arg1: i32) -> (i32, i32, i32, i32) {
    %c0_i32 = arith.constant 0 : i32
    %c0_i32_0 = arith.constant 0 : i32
    %c0_i32_1 = arith.constant 0 : i32
    %c0_i32_2 = arith.constant 0 : i32
    return %arg0, %c0_i32, %c0_i32_0, %c0_i32_1 : i32, i32, i32, i32
  }
}

</mosaic_0001>

<bundles_post_ra>
// kernel: dice_loss.1
= control target key start
LH: loop header
LB: loop body
LE: loop exit
PB: predicated region body
PF: predicated region fallthrough
CT: control target
= control target key end

     0   :  { %s548_s9 = smov 0   ;;  %s550_s10 = smov 0   ;;  %s600_s0 = inlined_call_operand.vmem [shape: f32[2,3,8,128], index: 0, kind: input, shape index: {}]   ;;  %s601_s1 = inlined_call_operand.vmem [shape: s32[2,8,128], index: 1, kind: input, shape index: {}]   ;;  %s602_s2 = inlined_call_operand.vmem [shape: f32[2,3,3,128], index: 2, kind: output, shape index: {}]  }
   0x1   :  { %s552_s11 = smov 0  }
   0x2 LB: > { %s24_s12 = sadd.s32 1, %s526_s10  ;;  %p461_p0 = scmp.ge.s32.totalorder %s530_s11, 1  ;;  %s530_s11 = sphi %s552_s11, %s12_s11   ;;  %s526_s10 = sphi %s550_s10, %s604_s10   ;;  %s522_s9 = sphi %s548_s9, %s603_s9  }
   0x3   : > { %p26_p1 = scmp.ge.s32.totalorder %s24_s12, 2  ;;  %p143_p2 = scmp.lt.s32.totalorder %s530_s11, 3 }
   0x5   : > { %s606_s12 = smov (%p26_p1, %s24_s12), 0  ;;  %p144_p3 = pnand %p461_p0, %p143_p2 }
   0x6   : > { %p175_p4 = scmp.lt.s32.totalorder (!%p144_p3), %s522_s9, 1  ;;  %v532_v5 = vmov (!%p144_p3), 0.0   ;;  %vm309_vm3 = vcmask (!%p144_p3), 1041409   ;;  %vm311_vm4 = vcmask (!%p144_p3), 1042434  }
   0x7   : > { %147 = sbr.rel (%p144_p3) target bundleno = 82 (0x52), region = 28 }
   0xe   : > { %s608_s9 = smov (!%p175_p4, %s522_s9), 1 }
   0xf   : > { %s473_s13 = smul.u32 24, %s608_s9  ;;  %s463_s14 = sshll.u32 %s608_s9, 3 }
  0x10   : > { %s189_s17 = scalar_lea.vmem %s601_s1, %s463_s14  ;;  %s474_s21 = smul.u32 12, %s608_s9 }
  0x11   : > { %s182_s20 = scalar_lea.vmem %s600_s0, %s473_s13  ;;  %v211_v0 = vld [vmem:[%s189_s17] sm:$0xff] }
  0x12   : > { %v208_v1 = vld [vmem:[%s182_s20] sm:$0xff]  ;;  %v209_v2 = vld [vmem:[%s182_s20 + $0x8] sm:$0xff]  ;;  %v210_v3 = vld [vmem:[%s182_s20 + $0x10] sm:$0xff]  ;;  %vm232_vm0 = vcmp.eq.s32.totalorder %v211_v0, 0  ;;  %vm233_vm1 = vcmp.eq.s32.totalorder %v211_v0, 1  ;;  %vm234_vm2 = vcmp.eq.s32.totalorder %v211_v0, 2  ;;  %s580_s24 = scalar_lea.vmem %s602_s2, %s474_s21 }
  0x13   : > { %v212_v4 = vmax.f32 %v208_v1, %v209_v2  ;;  %v465_v6 = vsel %vm232_vm0, 1.0, %v532_v5  ;;  %v466_v7 = vsel %vm233_vm1, 1.0, %v532_v5  ;;  %v467_v8 = vsel %vm234_vm2, 1.0, %v532_v5 }
  0x14   : > { %v318_v9 = vrot.slane %v465_v6, 4  ;;  %v324_v10 = vrot.slane %v466_v7, 4  ;;  %v330_v11 = vrot.slane %v467_v8, 4  ;;  %vm241_vm5 = vcmp.ge.s32.totalorder %v211_v0, 0 }
  0x15   : > { %v213_v12 = vmax.f32 %v212_v4, %v210_v3  ;;  %v468_v45 = vsel %vm241_vm5, 1.0, %v532_v5 }
  0x16   : > { %v319_v13 = vadd.f32 %v465_v6, %v318_v9  ;;  %v325_v14 = vadd.f32 %v466_v7, %v324_v10  ;;  %v331_v15 = vadd.f32 %v467_v8, %v330_v11 }
  0x17   : > { %v214_v16 = vsub.f32 %v208_v1, %v213_v12  ;;  %v215_v17 = vsub.f32 %v209_v2, %v213_v12  ;;  %v216_v18 = vsub.f32 %v210_v3, %v213_v12 }
  0x18   : > { %v320_v19 = vrot.slane %v319_v13, 2  ;;  %v326_v20 = vrot.slane %v325_v14, 2  ;;  %v332_v21 = vrot.slane %v331_v15, 2 }
  0x19   : > { %v217_v22 = vmul.f32 1.442695, %v214_v16  ;;  %v219_v23 = vmul.f32 1.442695, %v215_v17  ;;  %v221_v24 = vmul.f32 1.442695, %v216_v18 }
  0x1a   : > { %v321_v25 = vadd.f32 %v320_v19, %v319_v13  ;;  %v327_v26 = vadd.f32 %v326_v20, %v325_v14  ;;  %v333_v27 = vadd.f32 %v332_v21, %v331_v15 }
  0x1b   : > { %500 = vpow2.f32 %v217_v22 }
  0x1c   : > { %502 = vpow2.f32 %v219_v23  ;;  %v322_v28 = vrot.slane %v321_v25, 1  ;;  %v328_v29 = vrot.slane %v327_v26, 1  ;;  %v334_v30 = vrot.slane %v333_v27, 1 }
  0x1d   : > { %504 = vpow2.f32 %v221_v24 }
  0x1e   : > { %v323_v31 = vadd.f32 %v322_v28, %v321_v25  ;;  %v329_v32 = vadd.f32 %v328_v29, %v327_v26  ;;  %v335_v33 = vadd.f32 %v334_v30, %v333_v27 }
  0x20   : > { %v339_v34 = vsel %vm309_vm3, %v329_v32, %v323_v31 }
  0x21   : > { %v340_v35 = vsel %vm311_vm4, %v335_v33, %v339_v34 }
  0x22   : > { %469 = vst [vmem:[%s580_s24 + $0x4] sm:$0x7] %v340_v35 }
  0x25   : > { %v501_v36 = vpop.eup %500 }
  0x26   : > { %v503_v37 = vpop.eup %502 }
  0x27   : > { %v505_v38 = vpop.eup %504  ;;  %v223_v39 = vadd.f32 %v503_v37, %v501_v36 }
  0x29   : > { %v224_v40 = vadd.f32 %v505_v38, %v223_v39 }
  0x2b   : > { %506 = vrcp.f32 %v224_v40 }
  0x35   : > { %v507_v41 = vpop.eup %506 }
  0x36   : > { %v226_v42 = vmul.f32 %v507_v41, %v224_v40 }
  0x38   : > { %v227_v43 = vsub.f32 2.0, %v226_v42 }
  0x3a   : > { %v228_v44 = vmul.f32 %v507_v41, %v227_v43 }
  0x3c   : > { %v229_v46 = vmul.f32 %v501_v36, %v228_v44  ;;  %v230_v47 = vmul.f32 %v503_v37, %v228_v44  ;;  %v231_v48 = vmul.f32 %v505_v38, %v228_v44 }
  0x3e   : > { %v244_v49 = vmul.f32 %v468_v45, %v229_v46  ;;  %v245_v50 = vmul.f32 %v468_v45, %v230_v47  ;;  %v246_v51 = vmul.f32 %v468_v45, %v231_v48 }
  0x40   : > { %v250_v52 = vmul.f32 %v465_v6, %v244_v49  ;;  %v251_v53 = vmul.f32 %v466_v7, %v245_v50  ;;  %v252_v54 = vmul.f32 %v467_v8, %v246_v51  ;;  %v273_v55 = vmul.f32 %v244_v49, %v244_v49 }
  0x41   : > { %v274_v56 = vmul.f32 %v245_v50, %v245_v50  ;;  %v275_v57 = vmul.f32 %v246_v51, %v246_v51 }
  0x42   : > { %v288_v58 = vrot.slane %v250_v52, 4  ;;  %v294_v59 = vrot.slane %v251_v53, 4  ;;  %v300_v60 = vrot.slane %v252_v54, 4  ;;  %v347_v61 = vrot.slane %v273_v55, 4 }
  0x43   : > { %v353_v62 = vrot.slane %v274_v56, 4  ;;  %v359_v63 = vrot.slane %v275_v57, 4 }
  0x44   : > { %v289_v0 = vadd.f32 %v288_v58, %v250_v52  ;;  %v295_v1 = vadd.f32 %v294_v59, %v251_v53  ;;  %v301_v2 = vadd.f32 %v300_v60, %v252_v54  ;;  %v348_v3 = vadd.f32 %v347_v61, %v273_v55 }
  0x45   : > { %v354_v4 = vadd.f32 %v353_v62, %v274_v56  ;;  %v360_v5 = vadd.f32 %v359_v63, %v275_v57 }
  0x46   : > { %v290_v9 = vrot.slane %v289_v0, 2  ;;  %v296_v10 = vrot.slane %v295_v1, 2  ;;  %v302_v6 = vrot.slane %v301_v2, 2  ;;  %v349_v7 = vrot.slane %v348_v3, 2 }
  0x47   : > { %v355_v8 = vrot.slane %v354_v4, 2  ;;  %v361_v11 = vrot.slane %v360_v5, 2 }
  0x48   : > { %v291_v12 = vadd.f32 %v290_v9, %v289_v0  ;;  %v297_v13 = vadd.f32 %v296_v10, %v295_v1  ;;  %v303_v14 = vadd.f32 %v302_v6, %v301_v2  ;;  %v350_v15 = vadd.f32 %v349_v7, %v348_v3 }
  0x49   : > { %v356_v16 = vadd.f32 %v355_v8, %v354_v4  ;;  %v362_v17 = vadd.f32 %v361_v11, %v360_v5 }
  0x4a   : > { %v292_v18 = vrot.slane %v291_v12, 1  ;;  %v298_v19 = vrot.slane %v297_v13, 1  ;;  %v304_v20 = vrot.slane %v303_v14, 1  ;;  %v351_v21 = vrot.slane %v350_v15, 1 }
  0x4b   : > { %v357_v22 = vrot.slane %v356_v16, 1  ;;  %v363_v23 = vrot.slane %v362_v17, 1 }
  0x4c   : > { %v293_v24 = vadd.f32 %v292_v18, %v291_v12  ;;  %v299_v25 = vadd.f32 %v298_v19, %v297_v13  ;;  %v305_v26 = vadd.f32 %v304_v20, %v303_v14  ;;  %v352_v27 = vadd.f32 %v351_v21, %v350_v15 }
  0x4d   : > { %v358_v28 = vadd.f32 %v357_v22, %v356_v16  ;;  %v364_v29 = vadd.f32 %v363_v23, %v362_v17 }
  0x4e   : > { %v310_v30 = vsel %vm309_vm3, %v299_v25, %v293_v24 }
  0x4f   : > { %v312_v31 = vsel %vm311_vm4, %v305_v26, %v310_v30  ;;  %v368_v32 = vsel %vm309_vm3, %v358_v28, %v352_v27 }
  0x50   : > { %314 = vst [vmem:[%s580_s24] sm:$0x7] %v312_v31  ;;  %v369_v33 = vsel %vm311_vm4, %v364_v29, %v368_v32 }
  0x51   : > { %470 = vst [vmem:[%s580_s24 + $0x8] sm:$0x7] %v369_v33 }
  0x52 PF: > { %s12_s11 = sadd.s32 1, %s530_s11   ;;  %s603_s9 = smov %s526_s10 }
  0x53   : > { %p9_p5 = scmp.ge.s32.totalorder %s12_s11, 4   ;;  %s604_s10 = smov %s606_s12 }
  0x55   :  { %11 = sbr.rel (!%p9_p5) target bundleno = 2 (0x2), region = 73 }

</bundles_post_ra>
